<compile_context>
chip_gen: v5e
topology: v5e:2x2
jax: 0.10.0
libtpu: 0.0.40
codegen_flags: <defaults>
</compile_context>

<pallas_src>
import jax
import jax.numpy as jnp
from jax.experimental import pallas as pl
from jax.experimental.pallas import tpu as pltpu

LANE = 128      # vreg lane width
SUBLANE = 8     # vreg sublane width


def _round_up(n, m):
    return ((n + m - 1) // m) * m


def _mlp_kernel(x_ref, w1_ref, b1_ref, w2_ref, b2_ref, o_ref):
    """Fused Linear -> ReLU -> Linear on one row-tile; weights resident."""
    x = x_ref[...]                                                # (TM, Dp)
    h = jnp.dot(x, w1_ref[...], preferred_element_type=jnp.float32)
    h = jnp.maximum(h + b1_ref[...], 0.0)                         # (TM, Hp)
    out = jnp.dot(h, w2_ref[...], preferred_element_type=jnp.float32)
    out = out + b2_ref[...]                                       # (TM, Ep)
    o_ref[...] = out.astype(o_ref.dtype)


def triplet_net(x1, x2, x3, params):
    """TripletNet.forward: shared embedding net applied to x1, x2, x3,
    fused into a single Pallas call (triplet folded into the batch axis)."""
    w1, b1, w2, b2 = params
    B, D = x1.shape
    H = w1.shape[1]
    E = w2.shape[1]

    N = 3 * B                                   # triplet folded into rows
    Dp = _round_up(D, LANE)
    Hp = _round_up(H, LANE)
    Ep = _round_up(E, LANE)

    # Row tile: whole thing if small, otherwise 256-row tiles (parallel grid).
    TM = _round_up(N, SUBLANE) if N <= 256 else 256
    Np = _round_up(N, TM)

    def pad2(a, r, c):
        return jnp.pad(a, ((0, r - a.shape[0]), (0, c - a.shape[1])))

    x = jnp.concatenate([x1, x2, x3], axis=0)                # (3B, D)
    x = jnp.pad(x, ((0, Np - N), (0, Dp - D)))               # (Np, Dp)
    w1p = pad2(w1, Dp, Hp)
    b1p = pad2(b1, 1, Hp)
    w2p = pad2(w2, Hp, Ep)
    b2p = pad2(b2, 1, Ep)

    out = pl.pallas_call(
        _mlp_kernel,
        out_shape=jax.ShapeDtypeStruct((Np, Ep), jnp.float32),
        grid=(Np // TM,),
        in_specs=[
            pl.BlockSpec((TM, Dp), lambda i: (i, 0)),        # row tile of x
            pl.BlockSpec((Dp, Hp), lambda i: (0, 0)),        # W1 resident
            pl.BlockSpec((1, Hp), lambda i: (0, 0)),         # b1 resident
            pl.BlockSpec((Hp, Ep), lambda i: (0, 0)),        # W2 resident
            pl.BlockSpec((1, Ep), lambda i: (0, 0)),         # b2 resident
        ],
        out_specs=pl.BlockSpec((TM, Ep), lambda i: (i, 0)),
        compiler_params=pltpu.CompilerParams(
            dimension_semantics=("parallel",)),
    )(x, w1p, b1p, w2p, b2p)

    out = out[:N, :E]                                        # strip padding
    return out[:B], out[B:2 * B], out[2 * B:]


def get_embedding(x, params):
    """TripletNet.get_embedding: embed a single batch (reuses the same kernel
    by passing x three times and keeping the first output)."""
    return triplet_net(x, x, x, params)[0]


def init_params(key, d_in, hidden, embed_dim):
    k1, k2, k3, k4 = jax.random.split(key, 4)
    w1 = jax.random.normal(k1, (d_in, hidden), jnp.float32) * 0.1
    b1 = jax.random.normal(k2, (1, hidden), jnp.float32) * 0.01
    w2 = jax.random.normal(k3, (hidden, embed_dim), jnp.float32) * 0.1
    b2 = jax.random.normal(k4, (1, embed_dim), jnp.float32) * 0.01
    return w1, b1, w2, b2


if __name__ == "__main__":
    B, D_IN, HIDDEN, EMBED = 8, 32, 64, 16

    key = jax.random.PRNGKey(0)
    kp, kx1, kx2, kx3 = jax.random.split(key, 4)

    params = init_params(kp, D_IN, HIDDEN, EMBED)
    x1 = jax.random.normal(kx1, (B, D_IN), jnp.float32)
    x2 = jax.random.normal(kx2, (B, D_IN), jnp.float32)
    x3 = jax.random.normal(kx3, (B, D_IN), jnp.float32)

    o1, o2, o3 = jax.block_until_ready(triplet_net(x1, x2, x3, params))

    # Pure-JAX reference check of the embedding-net semantics.
    w1, b1, w2, b2 = params
    ref = lambda x: jnp.maximum(x @ w1 + b1, 0.0) @ w2 + b2
    assert o1.shape == (B, EMBED) and o2.shape == (B, EMBED) and o3.shape == (B, EMBED)
    assert jnp.allclose(o1, ref(x1), atol=1e-5)
    assert jnp.allclose(o2, ref(x2), atol=1e-5)
    assert jnp.allclose(o3, ref(x3), atol=1e-5)

    e = jax.block_until_ready(get_embedding(x1, params))
    assert jnp.allclose(e, ref(x1), atol=1e-5)

    print("KERNEL_OK")
</pallas_src>

<mosaic_0001>
module attributes {stable_mosaic.version = 11 : i64} {
  func.func @_mlp_kernel(%arg0: i32, %arg1: memref<24x128xf32, #tpu.memory_space<vmem>>, %arg2: memref<128x128xf32, #tpu.memory_space<vmem>>, %arg3: memref<1x128xf32, #tpu.memory_space<vmem>>, %arg4: memref<128x128xf32, #tpu.memory_space<vmem>>, %arg5: memref<1x128xf32, #tpu.memory_space<vmem>>, %arg6: memref<24x128xf32, #tpu.memory_space<vmem>>) attributes {dimension_semantics = [#tpu.dimension_semantics<parallel>], iteration_bounds = array<i64: 1>, scalar_prefetch = 0 : i64, scratch_operands = 0 : i64, tpu.core_type = #tpu.core_type<tc>, window_params = [{transform_indices = @transform_0, window_bounds = array<i64: 24, 128>}, {pipeline_mode = #tpu.pipeline_mode<synchronous>, transform_indices = @transform_1, window_bounds = array<i64: 128, 128>}, {pipeline_mode = #tpu.pipeline_mode<synchronous>, transform_indices = @transform_2, window_bounds = array<i64: 1, 128>}, {pipeline_mode = #tpu.pipeline_mode<synchronous>, transform_indices = @transform_3, window_bounds = array<i64: 128, 128>}, {pipeline_mode = #tpu.pipeline_mode<synchronous>, transform_indices = @transform_4, window_bounds = array<i64: 1, 128>}, {transform_indices = @transform_5, window_bounds = array<i64: 24, 128>}]} {
    %c0 = arith.constant 0 : index
    %c0_0 = arith.constant 0 : index
    %0 = vector.load %arg1[%c0, %c0_0] : memref<24x128xf32, #tpu.memory_space<vmem>>, vector<24x128xf32>
    %c0_1 = arith.constant 0 : index
    %c0_2 = arith.constant 0 : index
    %1 = vector.load %arg2[%c0_1, %c0_2] : memref<128x128xf32, #tpu.memory_space<vmem>>, vector<128x128xf32>
    %cst = arith.constant dense<0.000000e+00> : vector<24x128xf32>
    %2 = tpu.matmul %0, %1, %cst {dimension_numbers = #tpu.dot_dimension_numbers<[1], [0], [0], [1], [0, 0, 1, 1], [], []>} : vector<24x128xf32>, vector<128x128xf32>, vector<24x128xf32> -> vector<24x128xf32>
    %c0_3 = arith.constant 0 : index
    %c0_4 = arith.constant 0 : index
    %3 = vector.load %arg3[%c0_3, %c0_4] : memref<1x128xf32, #tpu.memory_space<vmem>>, vector<1x128xf32>
    %4 = vector.broadcast %3 : vector<1x128xf32> to vector<24x128xf32>
    %5 = arith.addf %2, %4 : vector<24x128xf32>
    %cst_5 = arith.constant 0.000000e+00 : f32
    %6 = vector.broadcast %cst_5 : f32 to vector<24x128xf32>
    %7 = arith.maximumf %5, %6 : vector<24x128xf32>
    %c0_6 = arith.constant 0 : index
    %c0_7 = arith.constant 0 : index
    %8 = vector.load %arg4[%c0_6, %c0_7] : memref<128x128xf32, #tpu.memory_space<vmem>>, vector<128x128xf32>
    %cst_8 = arith.constant dense<0.000000e+00> : vector<24x128xf32>
    %9 = tpu.matmul %7, %8, %cst_8 {dimension_numbers = #tpu.dot_dimension_numbers<[1], [0], [0], [1], [0, 0, 1, 1], [], []>} : vector<24x128xf32>, vector<128x128xf32>, vector<24x128xf32> -> vector<24x128xf32>
    %c0_9 = arith.constant 0 : index
    %c0_10 = arith.constant 0 : index
    %10 = vector.load %arg5[%c0_9, %c0_10] : memref<1x128xf32, #tpu.memory_space<vmem>>, vector<1x128xf32>
    %11 = vector.broadcast %10 : vector<1x128xf32> to vector<24x128xf32>
    %12 = arith.addf %9, %11 : vector<24x128xf32>
    %c0_11 = arith.constant 0 : index
    %c0_12 = arith.constant 0 : index
    %13 = vector.load %arg6[%c0_11, %c0_12] : memref<24x128xf32, #tpu.memory_space<vmem>>, vector<24x128xf32>
    tpu.vector_store %arg6[%c0_11, %c0_12], %12 {strides = array<i32>} : memref<24x128xf32, #tpu.memory_space<vmem>>, vector<24x128xf32>,
    return
  }
  func.func @transform_0(%arg0: i32) -> (i32, i32) {
    %c0_i32 = arith.constant 0 : i32
    %c0_i32_0 = arith.constant 0 : i32
    return %arg0, %c0_i32 : i32, i32
  }
  func.func @transform_1(%arg0: i32) -> (i32, i32) {
    %c0_i32 = arith.constant 0 : i32
    %c0_i32_0 = arith.constant 0 : i32
    %c0_i32_1 = arith.constant 0 : i32
    return %c0_i32, %c0_i32_0 : i32, i32
  }
  func.func @transform_2(%arg0: i32) -> (i32, i32) {
    %c0_i32 = arith.constant 0 : i32
    %c0_i32_0 = arith.constant 0 : i32
    %c0_i32_1 = arith.constant 0 : i32
    return %c0_i32, %c0_i32_0 : i32, i32
  }
  func.func @transform_3(%arg0: i32) -> (i32, i32) {
    %c0_i32 = arith.constant 0 : i32
    %c0_i32_0 = arith.constant 0 : i32
    %c0_i32_1 = arith.constant 0 : i32
    return %c0_i32, %c0_i32_0 : i32, i32
  }
  func.func @transform_4(%arg0: i32) -> (i32, i32) {
    %c0_i32 = arith.constant 0 : i32
    %c0_i32_0 = arith.constant 0 : i32
    %c0_i32_1 = arith.constant 0 : i32
    return %c0_i32, %c0_i32_0 : i32, i32
  }
  func.func @transform_5(%arg0: i32) -> (i32, i32) {
    %c0_i32 = arith.constant 0 : i32
    %c0_i32_0 = arith.constant 0 : i32
    return %arg0, %c0_i32 : i32, i32
  }
}

</mosaic_0001>

<bundles_post_ra>
// kernel: tpu_custom_call.1
= control target key start
LH: loop header
LB: loop body
LE: loop exit
PB: predicated region body
PF: predicated region fallthrough
CT: control target
= control target key end

     0   :  { %10 = vsyncpa [#allocation3], 0  ;;  %s397_s0 = inlined_call_operand.hbm [shape: f32[24,128], index: 0, kind: input, shape index: {}]   ;;  %s398_s1 = inlined_call_operand.hbm [shape: f32[128,128], index: 1, kind: input, shape index: {}]   ;;  %s399_s2 = inlined_call_operand.vmem [shape: f32[1,128], index: 2, kind: input, shape index: {}]   ;;  %s400_s3 = inlined_call_operand.hbm [shape: f32[128,128], index: 3, kind: input, shape index: {}]   ;;  %s401_s4 = inlined_call_operand.vmem [shape: f32[1,128], index: 4, kind: input, shape index: {}]   ;;  %s402_s5 = inlined_call_operand.hbm [shape: f32[24,128], index: 5, kind: output, shape index: {}]  }
   0x1   :  { %11 = vsyncpa [#allocation6], 0 }
   0x2   :  { %12 = vsyncpa [#allocation4], 0  ;;  %s30_s20 = sshll.u32 %s398_s1, 4  ;;  %s331_s21 = smov [#allocation5]   ;;  %s31_s20 = int_to_ptr.hbm [resolvable:$true] %s30_s20 }
   0x3   :  { %s32_s22 = sshll.u32 %s331_s21, 4  ;;  %s17_s25 = sshll.u32 %s397_s0, 4  ;;  %s33_s22 = int_to_ptr.vmem [resolvable:$true] %s32_s22  ;;  %s18_s25 = int_to_ptr.hbm [resolvable:$true] %s17_s25 }
   0x4   :  { %s332_s26 = smov 128   ;;  %s333_s27 = smov 8  }
   0x5   :  { %38 = dma.hbm_to_vmem [thread:$0]  %s31_s20, 2048, %s33_s22, [#allocation6], %s332_s26, %s332_s26, %s333_s27  }
   0x6   :  { %s334_s28 = smov [#allocation2]   ;;  %s45_s1 = sshll.u32 %s400_s3, 4  ;;  %s46_s1 = int_to_ptr.hbm [resolvable:$true] %s45_s1 }
   0x7   :  { %s19_s29 = sshll.u32 %s334_s28, 4  ;;  %s335_s0 = smov [#allocation7]   ;;  %s20_s29 = int_to_ptr.vmem [resolvable:$true] %s19_s29 }
   0x8   :  { %25 = dma.hbm_to_vmem [thread:$0]  %s18_s25, 384, %s20_s29, [#allocation3], %s332_s26, %s332_s26, %s333_s27  }
   0x9   :  { %s47_s7 = sshll.u32 %s335_s0, 4  ;;  %s48_s7 = int_to_ptr.vmem [resolvable:$true] %s47_s7 }
   0xa   :  { %53 = dma.hbm_to_vmem [thread:$0]  %s46_s1, 2048, %s48_s7, [#allocation6], %s332_s26, %s332_s26, %s333_s27  }
   0xb   :  { %325 = dma.done.wait [#allocation3], 384  }
   0xc   :  { %326 = vsyncadd [#allocation3], 4294966912 }
   0xd   :  { %327 = dma.done.wait [#allocation6], 4096  }
   0xe   :  { %328 = vsyncadd [#allocation6], 4294963200  ;;  %v86_v0 = vld [vmem:[#allocation5 + $0x78] sm:$0xff]  ;;  %v85_v1 = vld [vmem:[#allocation5 + $0x70] sm:$0xff]  ;;  %s175_s14 = sshll.u32 %s402_s5, 4  ;;  %s176_s14 = int_to_ptr.hbm [resolvable:$true] %s175_s14 }
   0xf   :  { %189 = vmatpush.msra.mxu2 %v86_v0  ;;  %91 = vmatpush.msra.mxu0 %v86_v0  ;;  %v84_v2 = vld [vmem:[#allocation5 + $0x68] sm:$0xff]  ;;  %v83_v3 = vld [vmem:[#allocation5 + $0x60] sm:$0xff]  ;;  %v82_v4 = vld [vmem:[#allocation5 + $0x58] sm:$0xff] }
  0x10   :  { %v81_v5 = vld [vmem:[#allocation5 + $0x50] sm:$0xff]  ;;  %v135_v6 = vld [vmem:[#allocation7 + $0x78] sm:$0xff]  ;;  %v80_v8 = vld [vmem:[#allocation5 + $0x48] sm:$0xff] }
  0x11   :  { %190 = vmatpush.msra.mxu2 %v85_v1  ;;  %92 = vmatpush.msra.mxu0 %v85_v1  ;;  %v134_v7 = vld [vmem:[#allocation7 + $0x70] sm:$0xff]  ;;  %v133_v9 = vld [vmem:[#allocation7 + $0x68] sm:$0xff]  ;;  %v79_v10 = vld [vmem:[#allocation5 + $0x40] sm:$0xff] }
  0x12   :  { %205 = vmatpush.msra.mxu3 %v135_v6  ;;  %140 = vmatpush.msra.mxu1 %v135_v6  ;;  %v132_v11 = vld [vmem:[#allocation7 + $0x60] sm:$0xff]  ;;  %v78_v12 = vld [vmem:[#allocation5 + $0x38] sm:$0xff]  ;;  %v77_v14 = vld [vmem:[#allocation5 + $0x30] sm:$0xff] }
  0x13   :  { %191 = vmatpush.msra.mxu2 %v84_v2  ;;  %93 = vmatpush.msra.mxu0 %v84_v2  ;;  %v131_v13 = vld [vmem:[#allocation7 + $0x58] sm:$0xff]  ;;  %v130_v15 = vld [vmem:[#allocation7 + $0x50] sm:$0xff]  ;;  %v76_v16 = vld [vmem:[#allocation5 + $0x28] sm:$0xff] }
  0x14   :  { %206 = vmatpush.msra.mxu3 %v134_v7  ;;  %141 = vmatpush.msra.mxu1 %v134_v7  ;;  %v129_v17 = vld [vmem:[#allocation7 + $0x48] sm:$0xff]  ;;  %v75_v18 = vld [vmem:[#allocation5 + $0x20] sm:$0xff]  ;;  %v74_v20 = vld [vmem:[#allocation5 + $0x18] sm:$0xff] }
  0x15   :  { %192 = vmatpush.msra.mxu2 %v83_v3  ;;  %94 = vmatpush.msra.mxu0 %v83_v3  ;;  %v128_v19 = vld [vmem:[#allocation7 + $0x40] sm:$0xff]  ;;  %v127_v21 = vld [vmem:[#allocation7 + $0x38] sm:$0xff]  ;;  %v73_v22 = vld [vmem:[#allocation5 + $0x10] sm:$0xff] }
  0x16   :  { %207 = vmatpush.msra.mxu3 %v133_v9  ;;  %142 = vmatpush.msra.mxu1 %v133_v9  ;;  %v126_v23 = vld [vmem:[#allocation7 + $0x30] sm:$0xff]  ;;  %v72_v24 = vld [vmem:[#allocation5 + $0x8] sm:$0xff]  ;;  %v71_v26 = vld [vmem:[#allocation5] sm:$0xff] }
  0x17   :  { %193 = vmatpush.msra.mxu2 %v82_v4  ;;  %95 = vmatpush.msra.mxu0 %v82_v4  ;;  %v125_v25 = vld [vmem:[#allocation7 + $0x28] sm:$0xff]  ;;  %v69_v27 = vld [vmem:[#allocation2 + $0x8] sm:$0xff]  ;;  %v124_v29 = vld [vmem:[#allocation7 + $0x20] sm:$0xff] }
  0x18   :  { %208 = vmatpush.msra.mxu3 %v132_v11  ;;  %143 = vmatpush.msra.mxu1 %v132_v11  ;;  %v68_v28 = vld [vmem:[#allocation2] sm:$0xff]  ;;  %v123_v30 = vld [vmem:[#allocation7 + $0x18] sm:$0xff]  ;;  %v122_v32 = vld [vmem:[#allocation7 + $0x10] sm:$0xff] }
  0x19   :  { %194 = vmatpush.msra.mxu2 %v81_v5  ;;  %96 = vmatpush.msra.mxu0 %v81_v5  ;;  %v70_v31 = vld [vmem:[#allocation2 + $0x10] sm:$0xff]  ;;  %v121_v33 = vld [vmem:[#allocation7 + $0x8] sm:$0xff]  ;;  %v120_v34 = vld [vmem:[#allocation7] sm:$0xff] }
  0x1a   :  { %209 = vmatpush.msra.mxu3 %v131_v13  ;;  %144 = vmatpush.msra.mxu1 %v131_v13  ;;  %v227_v35 = vld [vmem:[%s399_s2] ss:$0 sm:$0xff]  ;;  %s336_s2 = smov [#allocation8]  }
  0x1b   :  { %195 = vmatpush.msra.mxu2 %v80_v8  ;;  %97 = vmatpush.msra.mxu0 %v80_v8  ;;  %v228_v45 = vld [vmem:[%s401_s4] ss:$0 sm:$0xff]  ;;  %s173_s11 = sshll.u32 %s336_s2, 4  ;;  %s174_s11 = int_to_ptr.vmem [resolvable:$true] %s173_s11 }
  0x1c   :  { %210 = vmatpush.msra.mxu3 %v130_v15  ;;  %145 = vmatpush.msra.mxu1 %v130_v15 }
  0x1d   :  { %196 = vmatpush.msra.mxu2 %v79_v10  ;;  %98 = vmatpush.msra.mxu0 %v79_v10 }
  0x1e   :  { %211 = vmatpush.msra.mxu3 %v129_v17  ;;  %146 = vmatpush.msra.mxu1 %v129_v17 }
  0x1f   :  { %197 = vmatpush.msra.mxu2 %v78_v12  ;;  %99 = vmatpush.msra.mxu0 %v78_v12 }
  0x20   :  { %212 = vmatpush.msra.mxu3 %v128_v19  ;;  %147 = vmatpush.msra.mxu1 %v128_v19 }
  0x21   :  { %198 = vmatpush.msra.mxu2 %v77_v14  ;;  %100 = vmatpush.msra.mxu0 %v77_v14 }
  0x22   :  { %213 = vmatpush.msra.mxu3 %v127_v21  ;;  %148 = vmatpush.msra.mxu1 %v127_v21 }
  0x23   :  { %199 = vmatpush.msra.mxu2 %v76_v16  ;;  %101 = vmatpush.msra.mxu0 %v76_v16 }
  0x24   :  { %214 = vmatpush.msra.mxu3 %v126_v23  ;;  %149 = vmatpush.msra.mxu1 %v126_v23 }
  0x25   :  { %200 = vmatpush.msra.mxu2 %v75_v18  ;;  %102 = vmatpush.msra.mxu0 %v75_v18 }
  0x26   :  { %215 = vmatpush.msra.mxu3 %v125_v25  ;;  %150 = vmatpush.msra.mxu1 %v125_v25 }
  0x27   :  { %201 = vmatpush.msra.mxu2 %v74_v20  ;;  %103 = vmatpush.msra.mxu0 %v74_v20 }
  0x28   :  { %216 = vmatpush.msra.mxu3 %v124_v29  ;;  %151 = vmatpush.msra.mxu1 %v124_v29 }
  0x29   :  { %202 = vmatpush.msra.mxu2 %v73_v22  ;;  %104 = vmatpush.msra.mxu0 %v73_v22 }
  0x2a   :  { %217 = vmatpush.msra.mxu3 %v123_v30  ;;  %152 = vmatpush.msra.mxu1 %v123_v30 }
  0x2b   :  { %203 = vmatpush.msra.mxu2 %v72_v24  ;;  %105 = vmatpush.msra.mxu0 %v72_v24 }
  0x2c   :  { %218 = vmatpush.msra.mxu3 %v122_v32  ;;  %153 = vmatpush.msra.mxu1 %v122_v32 }
  0x2d   :  { %204 = vmatpush.msra.mxu2 %v71_v26  ;;  %106 = vmatpush.msra.mxu0 %v71_v26 }
  0x2e   :  { %110 = vmatmul.f32.vlgmr.msra.gmra.mxu2 %v69_v27  ;;  %107 = vmatmul.f32.vlgmr.msra.gmra.mxu0 %v68_v28 }
  0x2f   :  { %219 = vmatpush.msra.mxu3 %v121_v33  ;;  %154 = vmatpush.msra.mxu1 %v121_v33 }
  0x31   :  { %220 = vmatpush.msra.mxu3 %v120_v34  ;;  %155 = vmatpush.msra.mxu1 %v120_v34 }
  0x36   :  { %113 = vmatmul.f32.gmra.mxu2 %v70_v31 }
  0xab   :  { %v108_v36 = vpop.f32.mrf.mxu0 }
  0xac   :  { %v109_v37 = vadd.f32 %v227_v35, %v108_v36 }
  0xae   :  { %v117_v38 = vmax.f32 %v109_v37, 0.0 }
  0xb0   :  { %156 = vmatmul.f32.vlgmr.msra.gmra.mxu1 %v117_v38 }
  0xb1   :  { %v111_v39 = vpop.f32.mrf.mxu2 }
  0xb2   :  { %v112_v40 = vadd.f32 %v227_v35, %v111_v39 }
  0xb4   :  { %v118_v41 = vmax.f32 %v112_v40, 0.0 }
  0xb6   :  { %159 = vmatmul.f32.vlgmr.msra.gmra.mxu3 %v118_v41 }
  0xb9   :  { %v114_v42 = vpop.f32.mrf.mxu2 }
  0xba   :  { %v115_v43 = vadd.f32 %v227_v35, %v114_v42 }
  0xbc   :  { %v119_v44 = vmax.f32 %v115_v43, 0.0 }
  0xbe   :  { %162 = vmatmul.f32.gmra.mxu3 %v119_v44 }
 0x12d   :  { %v157_v46 = vpop.f32.mrf.mxu1 }
 0x12e   :  { %v158_v47 = vadd.f32 %v228_v45, %v157_v46 }
 0x130   :  { %166 = vst [vmem:[#allocation8] sm:$0xff] %v158_v47 }
 0x139   :  { %v160_v48 = vpop.f32.mrf.mxu3 }
 0x13a   :  { %v161_v49 = vadd.f32 %v228_v45, %v160_v48 }
 0x13c   :  { %167 = vst [vmem:[#allocation8 + $0x8] sm:$0xff] %v161_v49 }
 0x141   :  { %v163_v50 = vpop.f32.mrf.mxu3 }
 0x142   :  { %v164_v51 = vadd.f32 %v228_v45, %v163_v50 }
 0x144   :  { %168 = vst [vmem:[#allocation8 + $0x10] sm:$0xff] %v164_v51 }
 0x145   :  { %181 = dma.vmem_to_hbm [thread:$0]  %s174_s11, 384, %s176_s14, [#allocation4], %s332_s26, %s332_s26, %s333_s27  }
 0x146   :  { %329 = dma.done.wait [#allocation4], 384  }
 0x147   :  { %330 = vsyncadd [#allocation4], 4294966912 }
 0x148   :  { %186 = vsyncpa [#allocation3], 1 }
 0x149   :  { %187 = vsyncpa [#allocation6], 1 }
 0x14a   :  { %188 = vsyncpa [#allocation4], 1 }

</bundles_post_ra>
